<compile_context>
chip_gen: v7x
topology: tpu7x:2x2x1
jax: 0.10.0
libtpu: 0.0.40
codegen_flags: <defaults>
</compile_context>

<pallas_src>
import functools

import jax
import jax.numpy as jnp
from jax import lax
from jax.experimental import pallas as pl
from jax.experimental.pallas import tpu as pltpu

_LANE = 128
_SUBLANE = 8


def _round_up(x, m):
    return ((x + m - 1) // m) * m


def _default_num_partials():
    # 2 partial sums (leading "parallel" grid axis) only where there are 2 TensorCores.
    try:
        kind = jax.devices()[0].device_kind.lower()
    except Exception:
        return 1
    return 2 if ("v7" in kind or "tpu7" in kind) else 1


def focal_loss_kernel(logits_ref, labels_ref, out_ref, *,
                      n_valid, tile_n, tiles_per_partial, inv_n):
    # logits_ref: (tile_n, C) native dtype    labels_ref: (tile_n, 1) int32
    # out_ref:    (8, 128) f32 partial-sum block (every element holds the same value)
    p = pl.program_id(0)   # partial index ("parallel")
    i = pl.program_id(1)   # batch-tile index ("arbitrary" -> reduction axis)

    @pl.when(i == 0)
    def _init():
        out_ref[...] = jnp.zeros_like(out_ref)

    # load native dtype, cast in VMEM (halves HBM traffic for bf16 inputs)
    logits = logits_ref[...].astype(jnp.float32)                 # (tile_n, C)
    labels = labels_ref[...]                                     # (tile_n, 1) int32
    tn, c = logits.shape

    # numerically-stable log-softmax on `shifted` (the +max terms cancel in CE)
    m = jnp.max(logits, axis=-1, keepdims=True)                  # (tile_n, 1)
    shifted = logits - m
    sumexp = jnp.sum(jnp.exp(shifted), axis=-1, keepdims=True)   # (tile_n, 1)

    # gather shifted logit at the label: select-reduce with a (1, C) column iota
    # (no f32 one-hot materialization, no full-tile iota per step)
    col_ids = lax.broadcasted_iota(jnp.int32, (1, c), 1)
    shifted_y = jnp.sum(jnp.where(col_ids == labels, shifted, 0.0),
                        axis=-1, keepdims=True)                  # (tile_n, 1)

    ce = jnp.log(sumexp) - shifted_y                             # per-sample CE
    pt = jnp.exp(-ce)
    f_loss = (1.0 - pt) * ce                                     # alpha=1, gamma=1

    # zero out-of-range rows (ragged edge blocks + clamped duplicate blocks).
    # Must stay a select on the FINAL per-row loss so NaN/Inf garbage cannot leak.
    row0 = (p * tiles_per_partial + i) * tile_n
    row_ids = row0 + lax.broadcasted_iota(jnp.int32, (tn, 1), 0)
    f_loss = jnp.where(row_ids < n_valid, f_loss, 0.0)

    # accumulate into the resident output block (HBM writeback once per partial)
    out_ref[...] += jnp.sum(f_loss, keepdims=True)               # (1,1) -> (8,128) broadcast

    @pl.when(i == tiles_per_partial - 1)
    def _finalize():
        out_ref[...] = out_ref[...] * inv_n                      # mean: static 1/N


def focal_loss(logits, labels, *, num_partials=None, tile_n_max=None,
               vmem_budget=24 * 1024 * 1024):
    """logits: (N, C) float (any dtype), labels: (N,) int. Returns scalar mean focal loss."""
    n, c = logits.shape
    if num_partials is None:
        num_partials = _default_num_partials()

    labels_i32 = labels.astype(jnp.int32)
    n_rows = n
    if n < _SUBLANE:
        # only corner case where any padding remains: fewer than 8 rows total
        pad = _SUBLANE - n
        logits = jnp.pad(logits, ((0, pad), (0, 0)))
        labels_i32 = jnp.pad(labels_i32, (0, pad))
        n_rows = _SUBLANE
    labels2d = labels_i32.reshape(n_rows, 1)

    # --- tile sizing against a real VMEM budget -------------------------------------------
    # per-row VMEM bytes: double-buffered logits (lanes physically padded to 128),
    # double-buffered labels (1 lane pads to 128 in VMEM, int32), ~5 f32 full-tile temps.
    itemsize = jnp.dtype(logits.dtype).itemsize
    c_pad = _round_up(c, _LANE)
    per_row = (2 * c_pad * itemsize) + (2 * _LANE * 4) + (5 * c_pad * 4)
    cap = max(_SUBLANE, (vmem_budget // per_row) // _SUBLANE * _SUBLANE)
    if tile_n_max is not None:
        cap = min(cap, max(_SUBLANE, (tile_n_max // _SUBLANE) * _SUBLANE))
    tile_n = min(cap, max(_SUBLANE, (n_rows // _SUBLANE) * _SUBLANE))

    tiles_total = pl.cdiv(n_rows, tile_n)
    num_partials = max(1, min(num_partials, tiles_total))
    tiles_per_partial = pl.cdiv(tiles_total, num_partials)
    last_block = tiles_total - 1

    kernel = functools.partial(
        focal_loss_kernel,
        n_valid=n, tile_n=tile_n, tiles_per_partial=tiles_per_partial, inv_n=1.0 / n)

    def in_map(p, i):
        # clamp duplicate trailing steps of the last partial onto the last valid block;
        # the in-kernel row mask zeroes their contribution.
        return (jnp.minimum(p * tiles_per_partial + i, last_block), 0)

    partials = pl.pallas_call(
        kernel,
        out_shape=jax.ShapeDtypeStruct((num_partials * _SUBLANE, _LANE), jnp.float32),
        grid_spec=pltpu.PrefetchScalarGridSpec(
            num_scalar_prefetch=0,
            grid=(num_partials, tiles_per_partial),
            in_specs=[
                pl.BlockSpec((tile_n, c), in_map),   # last dim == full C: no lane pad in HBM
                pl.BlockSpec((tile_n, 1), in_map),
            ],
            out_specs=pl.BlockSpec((_SUBLANE, _LANE), lambda p, i: (p, 0)),
        ),
        compiler_params=pltpu.CompilerParams(
            dimension_semantics=("parallel", "arbitrary"),
            vmem_limit_bytes=32 * 1024 * 1024),
    )(logits, labels2d)

    # block for partial p holds one replicated value at rows [p*8, (p+1)*8)
    return jnp.sum(partials[0::_SUBLANE, 0])


def focal_loss_ref(logits, labels):
    # pure-JAX reference (F.cross_entropy reduction='none' + focal + mean, alpha=gamma=1)
    logits = logits.astype(jnp.float32)
    lse = jax.nn.logsumexp(logits, axis=-1)
    logit_y = jnp.take_along_axis(logits, labels[:, None].astype(jnp.int32), axis=-1)[:, 0]
    ce = lse - logit_y
    pt = jnp.exp(-ce)
    return jnp.mean((1.0 - pt) * ce)


if __name__ == "__main__":
    key = jax.random.PRNGKey(0)
    k1, k2, k3, k4, k5, k6 = jax.random.split(key, 6)

    # primary small test (matches the module's expected (N, C) logits / (N,) labels)
    N, C = 8, 32
    logits = jax.random.normal(k1, (N, C), dtype=jnp.float32)
    labels = jax.random.randint(k2, (N,), 0, C, dtype=jnp.int32)
    out = focal_loss(logits, labels)
    jax.block_until_ready(out)
    ref = focal_loss_ref(logits, labels)
    assert jnp.allclose(out, ref, rtol=1e-5, atol=1e-5), (out, ref)

    # lane-ragged class dim (C not multiple of 128) + ragged batch edge (N not mult of tile)
    N2, C2 = 30, 10
    logits2 = jax.random.normal(k3, (N2, C2), dtype=jnp.float32)
    labels2 = jax.random.randint(k4, (N2,), 0, C2, dtype=jnp.int32)
    out2 = focal_loss(logits2, labels2)
    jax.block_until_ready(out2)
    ref2 = focal_loss_ref(logits2, labels2)
    assert jnp.allclose(out2, ref2, rtol=1e-5, atol=1e-5), (out2, ref2)

    # multi-tile + two-partial path: exercises edge blocks, clamped duplicate steps, masking
    N3, C3 = 300, 17
    logits3 = jax.random.normal(k5, (N3, C3), dtype=jnp.float32)
    labels3 = jax.random.randint(k6, (N3,), 0, C3, dtype=jnp.int32)
    out3 = focal_loss(logits3, labels3, tile_n_max=64, num_partials=2)
    jax.block_until_ready(out3)
    ref3 = focal_loss_ref(logits3, labels3)
    assert jnp.allclose(out3, ref3, rtol=1e-5, atol=1e-5), (out3, ref3)

    print("KERNEL_OK")
</pallas_src>

<mosaic_0001>
module attributes {stable_mosaic.version = 11 : i64} {
  func.func @focal_loss_kernel(%arg0: i32, %arg1: i32, %arg2: memref<8x32xf32, #tpu.memory_space<vmem>>, %arg3: memref<8x1xi32, #tpu.memory_space<vmem>>, %arg4: memref<8x128xf32, #tpu.memory_space<vmem>>) attributes {dimension_semantics = [#tpu.dimension_semantics<parallel>, #tpu.dimension_semantics<arbitrary>], iteration_bounds = array<i64: 1, 1>, scalar_prefetch = 0 : i64, scratch_operands = 0 : i64, tpu.core_type = #tpu.core_type<tc>, window_params = [{transform_indices = @transform_0, window_bounds = array<i64: 8, 32>}, {transform_indices = @transform_1, window_bounds = array<i64: 8, 1>}, {transform_indices = @transform_2, window_bounds = array<i64: 8, 128>}]} {
    %c0_i32 = arith.constant 0 : i32
    %0 = arith.cmpi eq, %arg1, %c0_i32 : i32
    %1 = arith.extui %0 : i1 to i32
    %c0_i32_0 = arith.constant 0 : i32
    %2 = arith.cmpi ne, %1, %c0_i32_0 : i32
    scf.if %2 {
      %cst_18 = arith.constant 0.000000e+00 : f32
      %50 = vector.broadcast %cst_18 : f32 to vector<8x128xf32>
      %c0_19 = arith.constant 0 : index
      %c0_20 = arith.constant 0 : index
      %51 = vector.load %arg4[%c0_19, %c0_20] : memref<8x128xf32, #tpu.memory_space<vmem>>, vector<8x128xf32>
      tpu.vector_store %arg4[%c0_19, %c0_20], %50 {strides = array<i32>} : memref<8x128xf32, #tpu.memory_space<vmem>>, vector<8x128xf32>,
    } else {
    }
    %c0 = arith.constant 0 : index
    %c0_1 = arith.constant 0 : index
    %3 = vector.load %arg2[%c0, %c0_1] : memref<8x32xf32, #tpu.memory_space<vmem>>, vector<8x32xf32>
    %c0_2 = arith.constant 0 : index
    %c0_3 = arith.constant 0 : index
    %4 = vector.load %arg3[%c0_2, %c0_3] : memref<8x1xi32, #tpu.memory_space<vmem>>, vector<8x1xi32>
    %cst = arith.constant dense<0xFF800000> : vector<8xf32>
    %5 = vector.multi_reduction <maximumf>, %3, %cst [1] : vector<8x32xf32> to vector<8xf32>
    %6 = vector.shape_cast %5 : vector<8xf32> to vector<8x1xf32>
    %7 = vector.broadcast %6 : vector<8x1xf32> to vector<8x32xf32>
    %8 = arith.subf %3, %7 : vector<8x32xf32>
    %9 = math.exp %8 : vector<8x32xf32>
    %cst_4 = arith.constant dense<0.000000e+00> : vector<8xf32>
    %10 = vector.multi_reduction <add>, %9, %cst_4 [1] : vector<8x32xf32> to vector<8xf32>
    %11 = vector.shape_cast %10 : vector<8xf32> to vector<8x1xf32>
    %12 = tpu.iota {dimensions = array<i32: 1>} : vector<1x32xi32>
    %13 = vector.broadcast %12 : vector<1x32xi32> to vector<8x32xi32>
    %14 = vector.broadcast %4 : vector<8x1xi32> to vector<8x32xi32>
    %15 = arith.cmpi eq, %13, %14 : vector<8x32xi32>
    %cst_5 = arith.constant 0.000000e+00 : f32
    %16 = vector.broadcast %cst_5 : f32 to vector<8x32xf32>
    %17 = arith.select %15, %8, %16 : vector<8x32xi1>, vector<8x32xf32>
    %cst_6 = arith.constant dense<0.000000e+00> : vector<8xf32>
    %18 = vector.multi_reduction <add>, %17, %cst_6 [1] : vector<8x32xf32> to vector<8xf32>
    %19 = vector.shape_cast %18 : vector<8xf32> to vector<8x1xf32>
    %20 = math.log %11 : vector<8x1xf32>
    %21 = arith.subf %20, %19 : vector<8x1xf32>
    %cst_7 = arith.constant 0.000000e+00 : f32
    %22 = vector.broadcast %cst_7 : f32 to vector<8x1xf32>
    %23 = arith.subf %22, %21 : vector<8x1xf32>
    %24 = math.exp %23 : vector<8x1xf32>
    %cst_8 = arith.constant 1.000000e+00 : f32
    %25 = vector.broadcast %cst_8 : f32 to vector<8x1xf32>
    %26 = arith.subf %25, %24 : vector<8x1xf32>
    %27 = arith.mulf %26, %21 : vector<8x1xf32>
    %c1_i32 = arith.constant 1 : i32
    %28 = arith.muli %arg0, %c1_i32 : i32
    %29 = arith.addi %28, %arg1 : i32
    %c8_i32 = arith.constant 8 : i32
    %30 = arith.muli %29, %c8_i32 : i32
    %31 = tpu.iota {dimensions = array<i32: 0>} : vector<8x1xi32>
    %32 = vector.broadcast %30 : i32 to vector<8x1xi32>
    %33 = arith.addi %32, %31 : vector<8x1xi32>
    %c8_i32_9 = arith.constant 8 : i32
    %34 = vector.broadcast %c8_i32_9 : i32 to vector<8x1xi32>
    %35 = arith.cmpi slt, %33, %34 : vector<8x1xi32>
    %cst_10 = arith.constant 0.000000e+00 : f32
    %36 = vector.broadcast %cst_10 : f32 to vector<8x1xf32>
    %37 = arith.select %35, %27, %36 : vector<8x1xi1>, vector<8x1xf32>
    %c0_11 = arith.constant 0 : index
    %c0_12 = arith.constant 0 : index
    %38 = vector.load %arg4[%c0_11, %c0_12] : memref<8x128xf32, #tpu.memory_space<vmem>>, vector<8x128xf32>
    %39 = vector.shape_cast %37 : vector<8x1xf32> to vector<1x8x1xf32>
    %cst_13 = arith.constant dense<0.000000e+00> : vector<1xf32>
    %40 = vector.multi_reduction <add>, %39, %cst_13 [1, 2] : vector<1x8x1xf32> to vector<1xf32>
    %41 = vector.shape_cast %40 : vector<1xf32> to vector<1x1x1xf32>
    %42 = vector.extract %41[0, 0, 0] : f32 from vector<1x1x1xf32>
    %43 = vector.broadcast %42 : f32 to vector<1x1xf32>
    %44 = vector.broadcast %43 : vector<1x1xf32> to vector<8x128xf32>
    %45 = arith.addf %38, %44 : vector<8x128xf32>
    %c0_14 = arith.constant 0 : index
    %c0_15 = arith.constant 0 : index
    %46 = vector.load %arg4[%c0_14, %c0_15] : memref<8x128xf32, #tpu.memory_space<vmem>>, vector<8x128xf32>
    tpu.vector_store %arg4[%c0_14, %c0_15], %45 {strides = array<i32>} : memref<8x128xf32, #tpu.memory_space<vmem>>, vector<8x128xf32>,
    %c0_i32_16 = arith.constant 0 : i32
    %47 = arith.cmpi eq, %arg1, %c0_i32_16 : i32
    %48 = arith.extui %47 : i1 to i32
    %c0_i32_17 = arith.constant 0 : i32
    %49 = arith.cmpi ne, %48, %c0_i32_17 : i32
    scf.if %49 {
      %c0_18 = arith.constant 0 : index
      %c0_19 = arith.constant 0 : index
      %50 = vector.load %arg4[%c0_18, %c0_19] : memref<8x128xf32, #tpu.memory_space<vmem>>, vector<8x128xf32>
      %cst_20 = arith.constant 1.250000e-01 : f32
      %51 = vector.broadcast %cst_20 : f32 to vector<8x128xf32>
      %52 = arith.mulf %50, %51 : vector<8x128xf32>
      %c0_21 = arith.constant 0 : index
      %c0_22 = arith.constant 0 : index
      %53 = vector.load %arg4[%c0_21, %c0_22] : memref<8x128xf32, #tpu.memory_space<vmem>>, vector<8x128xf32>
      tpu.vector_store %arg4[%c0_21, %c0_22], %52 {strides = array<i32>} : memref<8x128xf32, #tpu.memory_space<vmem>>, vector<8x128xf32>,
    } else {
    }
    return
  }
  func.func @transform_0(%arg0: i32, %arg1: i32) -> (i32, i32) {
    %c1_i32 = arith.constant 1 : i32
    %0 = arith.muli %arg0, %c1_i32 : i32
    %1 = arith.addi %0, %arg1 : i32
    %c0_i32 = arith.constant 0 : i32
    %2 = arith.minsi %1, %c0_i32 : i32
    %c0_i32_0 = arith.constant 0 : i32
    %c0_i32_1 = arith.constant 0 : i32
    return %2, %c0_i32_0 : i32, i32
  }
  func.func @transform_1(%arg0: i32, %arg1: i32) -> (i32, i32) {
    %c1_i32 = arith.constant 1 : i32
    %0 = arith.muli %arg0, %c1_i32 : i32
    %1 = arith.addi %0, %arg1 : i32
    %c0_i32 = arith.constant 0 : i32
    %2 = arith.minsi %1, %c0_i32 : i32
    %c0_i32_0 = arith.constant 0 : i32
    %c0_i32_1 = arith.constant 0 : i32
    return %2, %c0_i32_0 : i32, i32
  }
  func.func @transform_2(%arg0: i32, %arg1: i32) -> (i32, i32) {
    %c0_i32 = arith.constant 0 : i32
    %c0_i32_0 = arith.constant 0 : i32
    return %arg0, %c0_i32 : i32, i32
  }
}

</mosaic_0001>

<bundles_post_ra>
// kernel: tpu_custom_call.1
= control target key start
LH: loop header
LB: loop body
LE: loop exit
PB: predicated region body
PF: predicated region fallthrough
CT: control target
= control target key end

     0   :  { %vm73_vm0 = vcmask 261120   ;;  %s230_s0 = inlined_call_operand.vmem [shape: f32[8,32], index: 0, kind: input, shape index: {}]   ;;  %s231_s1 = inlined_call_operand.vmem [shape: s32[8,1], index: 1, kind: input, shape index: {}]   ;;  %s232_s2 = inlined_call_operand.hbm [shape: f32[8,128], index: 2, kind: output, shape index: {}]  }
   0x1   :  { %v71_v0 = vld [vmem:[%s230_s0] sm:$0xff] }
   0x2   :  { %7 = vsyncpa [#allocation3], 0  ;;  %v74_v1 = vsel %vm73_vm0, %v71_v0, -inf  ;;  %v192_v2 = vmov 0   ;;  %v72_v3 = vld [vmem:[%s231_s1] sm:$0xff]  ;;  %v83_v7 = vlaneseq  ;;  %vm110_vm2 = vcmask 7168  }
   0x3   :  { %161 = vset.pattern.permute.xlu0 %v192_v2  ;;  %s193_s1 = smov [#allocation2]  }
   0x4   :  { %75 = vmax.xlane.f32.xlu0 %v74_v1  ;;  %v84_v8 = vand.u32 127, %v83_v7  ;;  %s136_s13 = sshll.u32 %s193_s1, 4  ;;  %s137_s13 = int_to_ptr.vmem [resolvable:$true] %s136_s13 }
   0x5   :  { %s168_s14 = scalar_lea.vmem %s137_s13, 128  ;;  %p173_p1 = scmp.lt.s32.totalorder %s137_s13, %s137_s13 }
   0x6   :  { %p169_p0 = scmp.ne.s32.totalorder %s137_s13, %s168_s14  ;;  %p174_p2 = scmp.lt.s32.totalorder %s168_s14, %s168_s14 }
   0x8   :  { %p175_p3 = por %p174_p2, %p173_p1 }
   0xa   :  { %p176_p4 = pnand %p175_p3, %p169_p0 }
  0x1a   :  { %86 = vperm.xlu0 %161, %v72_v3  }
  0x91   :  { %v76_v4 = vpop.xlane.xlu0 %75 }
  0x92   :  { %v77_v5 = vsub.f32 %v71_v0, %v76_v4 }
  0x94   :  { %v78_v6 = vmul.f32 1.442695, %v77_v5 }
  0x96   :  { %162 = vpow2.f32 %v78_v6 }
  0x99   :  { %v87_v9 = vpop.permute.xlu0 %86 }
  0x9a   :  { %vm88_vm1 = vcmp.eq.s32.totalorder %v84_v8, %v87_v9 }
  0x9b   :  { %v89_v12 = vsel %vm88_vm1, %v77_v5, 0.0 }
  0x9c   :  { %v90_v13 = vsel %vm73_vm0, %v89_v12, 0.0 }
  0xa0   :  { %v163_v10 = vpop.eup %162 }
  0xa1   :  { %v80_v11 = vsel %vm73_vm0, %v163_v10, 0.0 }
  0xa2   :  { %81 = vadd.xlane.f32.xlu1 %v80_v11 }
  0xa6   :  { %91 = vadd.xlane.f32.xlu1 %v90_v13 }
 0x12f   :  { %v82_v14 = vpop.xlane.xlu1 %81 }
 0x130   :  { %164 = vlog2.f32 %v82_v14 }
 0x133   :  { %v92_v17 = vpop.xlane.xlu1 %91 }
 0x13a   :  { %v165_v15 = vpop.eup %164 }
 0x13b   :  { %v94_v16 = vmul.f32 0.6931472, %v165_v15 }
 0x13d   :  { %v95_v18 = vsub.f32 %v94_v16, %v92_v17 }
 0x13f   :  { %v96_v19 = vsub.f32 0.0, %v95_v18 }
 0x141   :  { %v97_v20 = vmul.f32 1.442695, %v96_v19 }
 0x143   :  { %166 = vpow2.f32 %v97_v20 }
 0x14d   :  { %v167_v21 = vpop.eup %166 }
 0x14e   :  { %v99_v22 = vsub.f32 1.0, %v167_v21 }
 0x150   :  { %v100_v23 = vmul.f32 %v99_v22, %v95_v18 }
 0x152   :  { %v111_v24 = vsel %vm110_vm2, %v100_v23, 0.0 }
 0x153   :  { %112 = vadd.xlane.f32.xlu1 %v111_v24 }
 0x1e0   :  { %v113_v25 = vpop.xlane.xlu1 %112 }
 0x1e1   :  { %v114_v26 = vrot.slane %v113_v25, 4 }
 0x1e3   :  { %v115_v27 = vadd.f32 %v114_v26, %v113_v25 }
 0x1e5   :  { %v116_v28 = vrot.slane %v115_v27, 2 }
 0x1e7   :  { %v117_v29 = vadd.f32 %v116_v28, %v115_v27 }
 0x1e9   :  { %v118_v30 = vrot.slane %v117_v29, 1 }
 0x1eb   :  { %v119_v31 = vadd.f32 %v118_v30, %v117_v29 }
 0x1ed   :  { %156 = vpush %v119_v31 }
 0x21e   :  { %s157_s0 = spop %156 }
 0x21f   :  { %v121_v32 = vstv %s157_s0 }
 0x220   :  { %v128_v33 = vmul.f32 0.125, %v121_v32 }
 0x222   :  { %129 = vst [vmem:[#allocation2] sm:$0xff] %v128_v33 }
 0x223   :  { %179 = shalt.err (!%p176_p4)
}
 0x224   :  { %s180_s17 = scalar_lea.hbm %s232_s2, 128 }
 0x225   :  { %p181_p5 = scmp.ne.s32.totalorder %s232_s2, %s180_s17  ;;  %p184_p6 = scmp.lt.u32.totalorder %s180_s17, %s232_s2 }
 0x227   :  { %p186_p7 = pnand %p184_p6, %p181_p5 }
 0x229   :  { %189 = shalt.err (!%p186_p7)
}
 0x22a   :  { %139 = dma.vmem_to_hbm [thread:$0]  %s137_s13, 128, %s232_s2, [#allocation3]  }
 0x22b   :  { %190 = dma.done.wait [#allocation3], 128  }
 0x22c   :  { %191 = vsyncadd [#allocation3], 4294967168 }
 0x22d   :  { %143 = vsyncpa [#allocation3], 1 }

</bundles_post_ra>
